<compile_context>
chip_gen: v5e
topology: v5e:2x2
jax: 0.10.0
libtpu: 0.0.40
codegen_flags: <defaults>
</compile_context>

<pallas_src>
import jax
import jax.numpy as jnp
from jax import lax
from jax.experimental import pallas as pl
from jax.experimental.pallas import tpu as pltpu


def _round_up(x, m):
    return (x + m - 1) // m * m


def _contrastive_loss_kernel(im_ref, s_ref, pos_ref, neg_ref):
    i = pl.program_id(0)
    j = pl.program_id(1)

    # Per-row-block partial sums live in the resident output blocks (indexed
    # by i only); initialize them at the start of each inner j sweep.
    @pl.when(j == 0)
    def _():
        pos_ref[...] = jnp.zeros_like(pos_ref)
        neg_ref[...] = jnp.zeros_like(neg_ref)

    im = im_ref[...]
    s = s_ref[...]

    # MXU: im_block @ s_block.T — contract the feature (last) dim of both
    # operands (no transpose materialized), f32 accumulation.
    scores = lax.dot_general(
        im, s,
        dimension_numbers=(((1,), (1,)), ((), ())),
        preferred_element_type=jnp.float32)
    total = jnp.sum(jnp.maximum(scores, 0.0), keepdims=True)        # (1, 1)

    @pl.when(i != j)
    def _():
        # Off-diagonal block: everything is a negative-pair contribution.
        neg_ref[...] += total

    @pl.when(i == j)
    def _():
        # Diagonal block: both operands use identical batch blocking
        # (tm == tn), so the global diagonal is exactly the row-wise inner
        # product of the two blocks — no (tm, tm) iota/mask temporaries.
        rowdot = jnp.sum(im.astype(jnp.float32) * s.astype(jnp.float32),
                         axis=1, keepdims=True)                      # (tm, 1)
        diag = jnp.sum(jnp.maximum(rowdot, 0.0), keepdims=True)      # (1, 1)
        pos_ref[...] += diag
        neg_ref[...] += total - diag


def contrastive_loss(s, im, *, block_b=512, compute_dtype=None):
    """ContrastiveLoss forward (cosine / sum / all / no cap_ids).

    s, im: (batch, feature) arrays. Returns (loss, pos_score, neg_score).

    block_b: maximum batch tile. Rounded to the sublane multiple, made
        lane-dense (multiple of 128) for large batches, and shrunk to fit a
        VMEM budget that is safe on v5e/v6e (128 MiB) and v7x (64 MiB).
        Bigger tiles reduce HBM streaming traffic of s (~1/tm).
    compute_dtype: optionally cast operands (e.g. jnp.bfloat16) before the
        kernel — halves HBM traffic and uses the bf16 MXU path; the matmul
        still accumulates in f32.
    """
    B, D = s.shape
    assert im.shape == (B, D), (im.shape, s.shape)

    if compute_dtype is not None:
        s = s.astype(compute_dtype)
        im = im.astype(compute_dtype)
    itemsize = jnp.dtype(s.dtype).itemsize
    sublane = {4: 8, 2: 16, 1: 32}.get(itemsize, 8)

    # ---- Batch tile selection --------------------------------------------
    tm = max(sublane, min(int(block_b), _round_up(B, sublane)))
    tm = _round_up(tm, sublane)
    min_tile = sublane
    if B >= 128:
        # tm is also the score block's lane dimension: keep it lane-dense.
        tm = max(128, (tm // 128) * 128)
        min_tile = 128

    # Shrink until double-buffered full-D input blocks + f32 score
    # temporaries fit the per-step VMEM budget (conservative for v7x).
    def _vmem_est(t):
        return 2 * 2 * t * D * itemsize + 4 * t * t * 4

    vmem_budget = 40 * 1024 * 1024
    while tm > min_tile and _vmem_est(tm) > vmem_budget:
        tm = max(min_tile, _round_up(max(tm // 2, sublane), sublane))

    # ---- Batch padding (feature dim never needs padding: full-D blocks) ---
    B_pad = _round_up(B, tm)
    if B_pad != B:
        # Zero rows are exact: relu(0) = 0 for both diag and off-diag terms.
        s = jnp.pad(s, ((0, B_pad - B), (0, 0)))
        im = jnp.pad(im, ((0, B_pad - B), (0, 0)))
    nb = B_pad // tm

    est = _vmem_est(tm)
    vmem_limit = int(min(2 * est, 48 * 1024 * 1024)) if est > 12 * 1024 * 1024 else None

    pos_parts, neg_parts = pl.pallas_call(
        _contrastive_loss_kernel,
        out_shape=(
            jax.ShapeDtypeStruct((nb, 1, 1), jnp.float32),   # per-row-block pos
            jax.ShapeDtypeStruct((nb, 1, 1), jnp.float32),   # per-row-block neg
        ),
        grid=(nb, nb),
        in_specs=[
            # im rows: index constant in j -> DMA'd once per row-block.
            pl.BlockSpec((tm, D), lambda i, j: (i, 0)),
            # s rows: streamed over the inner j axis.
            pl.BlockSpec((tm, D), lambda i, j: (j, 0)),
        ],
        out_specs=(
            pl.BlockSpec((1, 1, 1), lambda i, j: (i, 0, 0)),
            pl.BlockSpec((1, 1, 1), lambda i, j: (i, 0, 0)),
        ),
        compiler_params=pltpu.CompilerParams(
            # Output blocks depend only on i -> i can be sharded across
            # TensorCores (v7x); j revisits the same output block -> arbitrary.
            dimension_semantics=("parallel", "arbitrary"),
            vmem_limit_bytes=vmem_limit,
        ),
    )(im, s)

    # direction='all' with identical masks in both branches -> factor 2.
    # Tiny scalar epilogue runs as plain XLA on (nb,)-sized partials.
    pos = 2.0 * jnp.sum(pos_parts)
    neg = 2.0 * jnp.sum(neg_parts)
    loss = -jnp.log(pos / (pos + neg))
    return loss, pos, neg


def _reference(s, im):
    """Plain-JAX reference mirroring the PyTorch forward (cosine, sum, all)."""
    scores = im @ s.T
    relu = jnp.maximum(scores, 0.0)
    eye = jnp.eye(scores.shape[0], dtype=bool)
    pos = 2.0 * jnp.sum(jnp.where(eye, relu, 0.0))
    neg = 2.0 * jnp.sum(jnp.where(eye, 0.0, relu))
    loss = -jnp.log(pos / (pos + neg))
    return loss, pos, neg


def _check(name, got, want, rtol, atol):
    g = jnp.asarray(got, jnp.float32)
    w = jnp.asarray(want, jnp.float32)
    assert bool(jnp.allclose(g, w, rtol=rtol, atol=atol)), (name, float(g), float(w))


if __name__ == "__main__":
    key = jax.random.PRNGKey(0)

    def make_inputs(k, B, D):
        k1, k2, k3 = jax.random.split(k, 3)
        # Shared "base" keeps diagonal scores positive -> finite log.
        base = jax.random.normal(k1, (B, D), dtype=jnp.float32)
        s = base + 0.1 * jax.random.normal(k2, (B, D), dtype=jnp.float32)
        im = base + 0.1 * jax.random.normal(k3, (B, D), dtype=jnp.float32)
        return s, im

    k1, k2, k3, k4 = jax.random.split(key, 4)

    # Case 1: single-block path (grid 1x1), small shapes.
    s1, im1 = make_inputs(k1, 8, 32)
    out1 = contrastive_loss(s1, im1)
    jax.block_until_ready(out1)
    ref1 = _reference(s1, im1)
    for n, g, w in zip(("loss", "pos", "neg"), out1, ref1):
        _check("case1_" + n, g, w, rtol=2e-2, atol=1e-2)

    # Case 2: multi-block path (grid 2x2), no padding.
    s2, im2 = make_inputs(k2, 16, 160)
    out2 = contrastive_loss(s2, im2, block_b=8)
    jax.block_until_ready(out2)
    ref2 = _reference(s2, im2)
    for n, g, w in zip(("loss", "pos", "neg"), out2, ref2):
        _check("case2_" + n, g, w, rtol=2e-2, atol=1e-1)

    # Case 3: batch-padding path (B=12 -> padded to 16, grid 2x2).
    s3, im3 = make_inputs(k3, 12, 96)
    out3 = contrastive_loss(s3, im3, block_b=8)
    jax.block_until_ready(out3)
    ref3 = _reference(s3, im3)
    for n, g, w in zip(("loss", "pos", "neg"), out3, ref3):
        _check("case3_" + n, g, w, rtol=2e-2, atol=1e-1)

    # Case 4: bf16-operand path (16-sublane tile), looser tolerance.
    s4, im4 = make_inputs(k4, 16, 128)
    out4 = contrastive_loss(s4, im4, block_b=16, compute_dtype=jnp.bfloat16)
    jax.block_until_ready(out4)
    ref4 = _reference(s4, im4)
    for n, g, w in zip(("loss", "pos", "neg"), out4, ref4):
        _check("case4_" + n, g, w, rtol=5e-2, atol=1.0)

    print("KERNEL_OK")
</pallas_src>

<mosaic_0001>
module attributes {stable_mosaic.version = 11 : i64} {
  func.func @_contrastive_loss_kernel(%arg0: i32, %arg1: i32, %arg2: memref<8x32xf32, #tpu.memory_space<vmem>>, %arg3: memref<8x32xf32, #tpu.memory_space<vmem>>, %arg4: memref<1x1x1xf32, #tpu.memory_space<vmem>>, %arg5: memref<1x1x1xf32, #tpu.memory_space<vmem>>) attributes {dimension_semantics = [#tpu.dimension_semantics<parallel>, #tpu.dimension_semantics<arbitrary>], iteration_bounds = array<i64: 1, 1>, scalar_prefetch = 0 : i64, scratch_operands = 0 : i64, tpu.core_type = #tpu.core_type<tc>, window_params = [{transform_indices = @transform_0, window_bounds = array<i64: 8, 32>}, {transform_indices = @transform_1, window_bounds = array<i64: 8, 32>}, {transform_indices = @transform_2, window_bounds = array<i64: 1, 1, 1>}, {transform_indices = @transform_3, window_bounds = array<i64: 1, 1, 1>}]} {
    %c0_i32 = arith.constant 0 : i32
    %0 = arith.cmpi eq, %arg1, %c0_i32 : i32
    %1 = arith.extui %0 : i1 to i32
    %c0_i32_0 = arith.constant 0 : i32
    %2 = arith.cmpi ne, %1, %c0_i32_0 : i32
    scf.if %2 {
      %cst_8 = arith.constant 0.000000e+00 : f32
      %19 = vector.broadcast %cst_8 : f32 to vector<1x1x1xf32>
      %c0_9 = arith.constant 0 : index
      %c0_10 = arith.constant 0 : index
      %c0_11 = arith.constant 0 : index
      %20 = vector.load %arg4[%c0_9, %c0_10, %c0_11] : memref<1x1x1xf32, #tpu.memory_space<vmem>>, vector<1x1x1xf32>
      tpu.vector_store %arg4[%c0_9, %c0_10, %c0_11], %19 {strides = array<i32>} : memref<1x1x1xf32, #tpu.memory_space<vmem>>, vector<1x1x1xf32>,
      %cst_12 = arith.constant 0.000000e+00 : f32
      %21 = vector.broadcast %cst_12 : f32 to vector<1x1x1xf32>
      %c0_13 = arith.constant 0 : index
      %c0_14 = arith.constant 0 : index
      %c0_15 = arith.constant 0 : index
      %22 = vector.load %arg5[%c0_13, %c0_14, %c0_15] : memref<1x1x1xf32, #tpu.memory_space<vmem>>, vector<1x1x1xf32>
      tpu.vector_store %arg5[%c0_13, %c0_14, %c0_15], %21 {strides = array<i32>} : memref<1x1x1xf32, #tpu.memory_space<vmem>>, vector<1x1x1xf32>,
    } else {
    }
    %c0 = arith.constant 0 : index
    %c0_1 = arith.constant 0 : index
    %3 = vector.load %arg2[%c0, %c0_1] : memref<8x32xf32, #tpu.memory_space<vmem>>, vector<8x32xf32>
    %c0_2 = arith.constant 0 : index
    %c0_3 = arith.constant 0 : index
    %4 = vector.load %arg3[%c0_2, %c0_3] : memref<8x32xf32, #tpu.memory_space<vmem>>, vector<8x32xf32>
    %cst = arith.constant dense<0.000000e+00> : vector<8x8xf32>
    %5 = tpu.matmul %3, %4, %cst {dimension_numbers = #tpu.dot_dimension_numbers<[1], [1], [0], [0], [0, 0, 1, 0], [], []>} : vector<8x32xf32>, vector<8x32xf32>, vector<8x8xf32> -> vector<8x8xf32>
    %cst_4 = arith.constant 0.000000e+00 : f32
    %6 = vector.broadcast %cst_4 : f32 to vector<8x8xf32>
    %7 = arith.maximumf %5, %6 : vector<8x8xf32>
    %8 = vector.shape_cast %7 : vector<8x8xf32> to vector<1x8x8xf32>
    %cst_5 = arith.constant dense<0.000000e+00> : vector<1xf32>
    %9 = vector.multi_reduction <add>, %8, %cst_5 [1, 2] : vector<1x8x8xf32> to vector<1xf32>
    %10 = vector.shape_cast %9 : vector<1xf32> to vector<1x1x1xf32>
    %11 = vector.extract %10[0, 0, 0] : f32 from vector<1x1x1xf32>
    %12 = vector.broadcast %11 : f32 to vector<1x1xf32>
    %13 = arith.cmpi ne, %arg0, %arg1 : i32
    %14 = arith.extui %13 : i1 to i32
    %c0_i32_6 = arith.constant 0 : i32
    %15 = arith.cmpi ne, %14, %c0_i32_6 : i32
    scf.if %15 {
      %c0_8 = arith.constant 0 : index
      %c0_9 = arith.constant 0 : index
      %c0_10 = arith.constant 0 : index
      %19 = vector.load %arg5[%c0_8, %c0_9, %c0_10] : memref<1x1x1xf32, #tpu.memory_space<vmem>>, vector<1x1x1xf32>
      %20 = vector.shape_cast %12 : vector<1x1xf32> to vector<1x1x1xf32>
      %21 = arith.addf %19, %20 : vector<1x1x1xf32>
      %c0_11 = arith.constant 0 : index
      %c0_12 = arith.constant 0 : index
      %c0_13 = arith.constant 0 : index
      %22 = vector.load %arg5[%c0_11, %c0_12, %c0_13] : memref<1x1x1xf32, #tpu.memory_space<vmem>>, vector<1x1x1xf32>
      tpu.vector_store %arg5[%c0_11, %c0_12, %c0_13], %21 {strides = array<i32>} : memref<1x1x1xf32, #tpu.memory_space<vmem>>, vector<1x1x1xf32>,
    } else {
    }
    %16 = arith.cmpi eq, %arg0, %arg1 : i32
    %17 = arith.extui %16 : i1 to i32
    %c0_i32_7 = arith.constant 0 : i32
    %18 = arith.cmpi ne, %17, %c0_i32_7 : i32
    scf.if %18 {
      %19 = arith.mulf %3, %4 : vector<8x32xf32>
      %cst_8 = arith.constant dense<0.000000e+00> : vector<8xf32>
      %20 = vector.multi_reduction <add>, %19, %cst_8 [1] : vector<8x32xf32> to vector<8xf32>
      %21 = vector.shape_cast %20 : vector<8xf32> to vector<8x1xf32>
      %cst_9 = arith.constant 0.000000e+00 : f32
      %22 = vector.broadcast %cst_9 : f32 to vector<8x1xf32>
      %23 = arith.maximumf %21, %22 : vector<8x1xf32>
      %24 = vector.shape_cast %23 : vector<8x1xf32> to vector<1x8x1xf32>
      %cst_10 = arith.constant dense<0.000000e+00> : vector<1xf32>
      %25 = vector.multi_reduction <add>, %24, %cst_10 [1, 2] : vector<1x8x1xf32> to vector<1xf32>
      %26 = vector.shape_cast %25 : vector<1xf32> to vector<1x1x1xf32>
      %27 = vector.extract %26[0, 0, 0] : f32 from vector<1x1x1xf32>
      %28 = vector.broadcast %27 : f32 to vector<1x1xf32>
      %c0_11 = arith.constant 0 : index
      %c0_12 = arith.constant 0 : index
      %c0_13 = arith.constant 0 : index
      %29 = vector.load %arg4[%c0_11, %c0_12, %c0_13] : memref<1x1x1xf32, #tpu.memory_space<vmem>>, vector<1x1x1xf32>
      %30 = vector.shape_cast %28 : vector<1x1xf32> to vector<1x1x1xf32>
      %31 = arith.addf %29, %30 : vector<1x1x1xf32>
      %c0_14 = arith.constant 0 : index
      %c0_15 = arith.constant 0 : index
      %c0_16 = arith.constant 0 : index
      %32 = vector.load %arg4[%c0_14, %c0_15, %c0_16] : memref<1x1x1xf32, #tpu.memory_space<vmem>>, vector<1x1x1xf32>
      tpu.vector_store %arg4[%c0_14, %c0_15, %c0_16], %31 {strides = array<i32>} : memref<1x1x1xf32, #tpu.memory_space<vmem>>, vector<1x1x1xf32>,
      %c0_17 = arith.constant 0 : index
      %c0_18 = arith.constant 0 : index
      %c0_19 = arith.constant 0 : index
      %33 = vector.load %arg5[%c0_17, %c0_18, %c0_19] : memref<1x1x1xf32, #tpu.memory_space<vmem>>, vector<1x1x1xf32>
      %34 = arith.subf %12, %28 : vector<1x1xf32>
      %35 = vector.shape_cast %34 : vector<1x1xf32> to vector<1x1x1xf32>
      %36 = arith.addf %33, %35 : vector<1x1x1xf32>
      %c0_20 = arith.constant 0 : index
      %c0_21 = arith.constant 0 : index
      %c0_22 = arith.constant 0 : index
      %37 = vector.load %arg5[%c0_20, %c0_21, %c0_22] : memref<1x1x1xf32, #tpu.memory_space<vmem>>, vector<1x1x1xf32>
      tpu.vector_store %arg5[%c0_20, %c0_21, %c0_22], %36 {strides = array<i32>} : memref<1x1x1xf32, #tpu.memory_space<vmem>>, vector<1x1x1xf32>,
    } else {
    }
    return
  }
  func.func @transform_0(%arg0: i32, %arg1: i32) -> (i32, i32) {
    %c0_i32 = arith.constant 0 : i32
    %c0_i32_0 = arith.constant 0 : i32
    return %arg0, %c0_i32 : i32, i32
  }
  func.func @transform_1(%arg0: i32, %arg1: i32) -> (i32, i32) {
    %c0_i32 = arith.constant 0 : i32
    %c0_i32_0 = arith.constant 0 : i32
    return %arg1, %c0_i32 : i32, i32
  }
  func.func @transform_2(%arg0: i32, %arg1: i32) -> (i32, i32, i32) {
    %c0_i32 = arith.constant 0 : i32
    %c0_i32_0 = arith.constant 0 : i32
    %c0_i32_1 = arith.constant 0 : i32
    return %arg0, %c0_i32, %c0_i32_0 : i32, i32, i32
  }
  func.func @transform_3(%arg0: i32, %arg1: i32) -> (i32, i32, i32) {
    %c0_i32 = arith.constant 0 : i32
    %c0_i32_0 = arith.constant 0 : i32
    %c0_i32_1 = arith.constant 0 : i32
    return %arg0, %c0_i32, %c0_i32_0 : i32, i32, i32
  }
}

</mosaic_0001>

<bundles_post_ra>
// kernel: tpu_custom_call.1
= control target key start
LH: loop header
LB: loop body
LE: loop exit
PB: predicated region body
PF: predicated region fallthrough
CT: control target
= control target key end

     0   :  { %9 = vsyncpa [#allocation3], 0  ;;  %s319_s0 = inlined_call_operand.hbm [shape: f32[8,32], index: 0, kind: input, shape index: {}]   ;;  %s320_s1 = inlined_call_operand.hbm [shape: f32[8,32], index: 1, kind: input, shape index: {}]   ;;  %s321_s2 = inlined_call_operand.hbm [shape: f32[1,1,1], index: 2, kind: output, shape index: {0}]   ;;  %s322_s3 = inlined_call_operand.hbm [shape: f32[1,1,1], index: 3, kind: output, shape index: {1}]  }
   0x1   :  { %10 = vsyncpa [#allocation6], 0 }
   0x2   :  { %11 = vsyncpa [#allocation4], 0 }
   0x3   :  { %12 = vsyncpa [#allocation9], 0  ;;  %s18_s14 = sshll.u32 %s319_s0, 4  ;;  %s278_s15 = smov [#allocation2]   ;;  %s19_s14 = int_to_ptr.hbm [resolvable:$true] %s18_s14 }
   0x4   :  { %s20_s16 = sshll.u32 %s278_s15, 4  ;;  %s29_s19 = sshll.u32 %s320_s1, 4  ;;  %s21_s16 = int_to_ptr.vmem [resolvable:$true] %s20_s16  ;;  %s30_s19 = int_to_ptr.hbm [resolvable:$true] %s29_s19 }
   0x5   :  { %23 = dma.hbm_to_vmem [thread:$0]  %s19_s14, 128, %s21_s16, [#allocation3]  }
   0x6   :  { %s279_s20 = smov [#allocation5]  }
   0x7   :  { %s31_s21 = sshll.u32 %s279_s20, 4  ;;  %s32_s21 = int_to_ptr.vmem [resolvable:$true] %s31_s21 }
   0x8   :  { %34 = dma.hbm_to_vmem [thread:$0]  %s30_s19, 128, %s32_s21, [#allocation6]  }
   0x9   :  { %270 = dma.done.wait [#allocation3], 128  }
   0xa   :  { %271 = vsyncadd [#allocation3], 4294967168 }
   0xb   :  { %272 = dma.done.wait [#allocation6], 128  }
   0xc   :  { %273 = vsyncadd [#allocation6], 4294967168  ;;  %vm47_vm0 = vcmask 0   ;;  %v280_v0 = vmov 0.0   ;;  %vm52_vm1 = vcmask 261120   ;;  %v50_v1 = vld [vmem:[#allocation2] sm:$0xff] }
   0xd   :  { %48 = vst.msk [vmem:[#allocation7] sm:$0x1] %vm47_vm0, %v280_v0  ;;  %v51_v2 = vld [vmem:[#allocation5] sm:$0xff]  ;;  %vm109_vm2 = vcmask 7168   ;;  %vm80_vm3 = vcmask 64512   ;;  %s281_s0 = smov [#allocation7]  }
   0xe   :  { %49 = vst.msk [vmem:[#allocation8] sm:$0x1] %vm47_vm0, %v280_v0  ;;  %163 = vmatpush.xpose.msk.msra.mxu0 %vm52_vm1, %v51_v2  ;;  %v104_v3 = vmul.f32 %v51_v2, %v50_v1  ;;  %s134_s1 = sshll.u32 %s281_s0, 4  ;;  %s136_s25 = sshll.u32 %s321_s2, 4  ;;  %s135_s1 = int_to_ptr.vmem [resolvable:$true] %s134_s1  ;;  %s137_s25 = int_to_ptr.hbm [resolvable:$true] %s136_s25 }
   0xf   :  { %s282_s27 = smov [#allocation8]   ;;  %s147_s4 = sshll.u32 %s322_s3, 4  ;;  %s148_s4 = int_to_ptr.hbm [resolvable:$true] %s147_s4 }
  0x10   :  { %v105_v4 = vsel %vm52_vm1, %v104_v3, 0.0  ;;  %s145_s28 = sshll.u32 %s282_s27, 4  ;;  %s146_s28 = int_to_ptr.vmem [resolvable:$true] %s145_s28 }
  0x11   :  { %164 = vmatmul.msk.f32.vlgmr.msra.gmra.mxu0 %vm52_vm1, %v50_v1  ;;  %106 = vadd.xlane.f32.xlu0 %v105_v4 }
  0x14   :  { %v121_v25 = vld [vmem:[#allocation7] sm:$0x1] }
  0x15   :  { %v125_v28 = vld [vmem:[#allocation8] sm:$0x1] }
  0x84   :  { %v107_v5 = vpop.xlane.xlu0 %106 }
  0x85   :  { %v108_v6 = vmax.f32 %v107_v5, 0.0 }
  0x87   :  { %v110_v7 = vsel %vm109_vm2, %v108_v6, 0.0 }
  0x88   :  { %111 = vadd.xlane.f32.xlu1 %v110_v7 }
  0x8e   :  { %v76_v8 = vpop.f32.mrf.mxu0 }
  0x8f   :  { %v79_v9 = vmax.f32 %v76_v8, 0.0 }
  0x91   :  { %v81_v10 = vsel %vm80_vm3, %v79_v9, 0.0 }
  0x92   :  { %82 = vadd.xlane.f32.xlu0 %v81_v10 }
  0xfb   :  { %v112_v11 = vpop.xlane.xlu1 %111 }
  0xfc   :  { %v113_v12 = vrot.slane %v112_v11, 4 }
  0xfe   :  { %v114_v13 = vadd.f32 %v113_v12, %v112_v11 }
 0x100   :  { %v115_v14 = vrot.slane %v114_v13, 2 }
 0x102   :  { %v116_v18 = vadd.f32 %v115_v14, %v114_v13 }
 0x104   :  { %v117_v21 = vrot.slane %v116_v18, 1 }
 0x105   :  { %v83_v15 = vpop.xlane.xlu0 %82 }
 0x106   :  { %v84_v16 = vrot.slane %v83_v15, 4  ;;  %v118_v24 = vadd.f32 %v117_v21, %v116_v18 }
 0x108   :  { %v85_v17 = vadd.f32 %v84_v16, %v83_v15 }
 0x10a   :  { %v86_v19 = vrot.slane %v85_v17, 2 }
 0x10c   :  { %v87_v20 = vadd.f32 %v86_v19, %v85_v17 }
 0x10e   :  { %v88_v22 = vrot.slane %v87_v20, 1 }
 0x110   :  { %v89_v23 = vadd.f32 %v88_v22, %v87_v20 }
 0x112   :  { %165 = vpush %v89_v23 }
 0x113   :  { %167 = vpush %v118_v24 }
 0x143   :  { %s166_s22 = spop %165 }
 0x144   :  { %v91_v26 = vstv %s166_s22  ;;  %s168_s26 = spop %167 }
 0x145   :  { %v120_v27 = vstv %s168_s26 }
 0x146   :  { %v122_v29 = vadd.f32 %v121_v25, %v120_v27  ;;  %v126_v30 = vsub.f32 %v91_v26, %v120_v27 }
 0x148   :  { %v127_v31 = vadd.f32 %v126_v30, %v125_v28  ;;  %124 = vst.msk [vmem:[#allocation7] sm:$0x1] %vm47_vm0, %v122_v29 }
 0x149   :  { %139 = dma.vmem_to_hbm [thread:$0]  %s135_s1, 16, %s137_s25, [#allocation4]  }
 0x14a   :  { %128 = vst.msk [vmem:[#allocation8] sm:$0x1] %vm47_vm0, %v127_v31 }
 0x14b   :  { %150 = dma.vmem_to_hbm [thread:$0]  %s146_s28, 16, %s148_s4, [#allocation9]  }
 0x14c   :  { %274 = dma.done.wait [#allocation4], 16  }
 0x14d   :  { %275 = vsyncadd [#allocation4], 4294967280 }
 0x14e   :  { %276 = dma.done.wait [#allocation9], 16  }
 0x14f   :  { %277 = vsyncadd [#allocation9], 4294967280 }
 0x150   :  { %159 = vsyncpa [#allocation3], 1 }
 0x151   :  { %160 = vsyncpa [#allocation6], 1 }
 0x152   :  { %161 = vsyncpa [#allocation4], 1 }
 0x153   :  { %162 = vsyncpa [#allocation9], 1 }

</bundles_post_ra>
